<compile_context>
chip_gen: v5e
topology: v5e:2x2
jax: 0.10.0
libtpu: 0.0.40
codegen_flags: <defaults>
</compile_context>

<pallas_src>
import functools
import math

import jax
import jax.numpy as jnp
from jax import lax
from jax.experimental import pallas as pl
from jax.experimental.pallas import tpu as pltpu


def _round_up(a, m):
    return (a + m - 1) // m * m


def _pl_loss_kernel(x_ref, w_ref, b_ref, y_ref, mask_ref, o_ref, acc_ref, *,
                    th, n_classes):
    k = pl.program_id(1)

    # ---- accumulate logits over the K (feature) tiles on the MXU ----------
    @pl.when(k == 0)
    def _():
        acc_ref[...] = jnp.zeros_like(acc_ref)

    acc_ref[...] += jnp.dot(x_ref[...], w_ref[...],
                            preferred_element_type=jnp.float32)

    # ---- epilogue on the last K tile --------------------------------------
    @pl.when(k == pl.num_programs(1) - 1)
    def _():
        neg = jnp.float32(-1e30)
        logits = acc_ref[...] + b_ref[...]                       # [Bt, NCp]
        class_ids = lax.broadcasted_iota(jnp.int32, logits.shape, 1)
        valid = class_ids < n_classes
        # Padded class lanes must not perturb the log-softmax denominator.
        logits = jnp.where(valid, logits, neg)

        # y_probs = softmax(y, axis=1) with padded lanes forced to prob 0.
        y = jnp.where(valid, y_ref[...], neg)
        y_max = jnp.max(y, axis=1, keepdims=True)
        y_exp = jnp.exp(y - y_max)
        y_probs = y_exp * pl.reciprocal(
            jnp.sum(y_exp, axis=1, keepdims=True), approx=True)  # [Bt, NCp]

        # one-hot of argmax (first max index, like torch.max(1)[1]).
        max_p = jnp.max(y_probs, axis=1, keepdims=True)
        is_max = y_probs == max_p
        n_pad = logits.shape[1]
        argmax_idx = jnp.min(jnp.where(is_max, class_ids, n_pad),
                             axis=1, keepdims=True)              # [Bt, 1]
        onehot = (class_ids == argmax_idx).astype(jnp.float32)   # [Bt, NCp]

        # confidence gate.
        gt = jnp.max((y_probs > th).astype(jnp.float32),
                     axis=1, keepdims=True)                      # [Bt, 1]
        p_target = gt * 10.0 * onehot + (1.0 - gt) * y_probs     # [Bt, NCp]

        # log_softmax(logits, 1).
        l_max = jnp.max(logits, axis=1, keepdims=True)
        shifted = logits - l_max
        lse = jnp.log(jnp.sum(jnp.exp(shifted), axis=1, keepdims=True))
        log_sm = shifted - lse                                   # [Bt, NCp]

        # per-(sample, class) contributions; padded lanes -> 0, padded rows
        # are killed by mask == 0.  Final sum and /batch happen outside.
        contrib = jnp.where(valid, p_target * log_sm, 0.0) * mask_ref[...]
        o_ref[...] = -contrib


def pl_pseudo_label_loss(x, y, mask, w, b, threshold=0.95, block_k=512):
    """Pallas implementation of PL.forward with a linear stand-in model."""
    batch = x.shape[0]
    n_classes = y.shape[1]
    d = int(math.prod(x.shape[1:]))

    # ---- padding / tiling geometry ----------------------------------------
    nc_pad = _round_up(n_classes, 128)                 # lane-dense class axis
    b_tile = 128 if batch > 128 else _round_up(batch, 8)
    b_pad = _round_up(batch, b_tile)
    tk = min(block_k, _round_up(d, 128))
    d_pad = _round_up(d, tk)
    nb = b_pad // b_tile
    nk = d_pad // tk

    # ---- padded operands (bf16 matmul stream, f32 epilogue operands) ------
    x_flat = x.reshape(batch, d)
    x_p = jnp.zeros((b_pad, d_pad), jnp.bfloat16)
    x_p = x_p.at[:batch, :d].set(x_flat.astype(jnp.bfloat16))
    w_p = jnp.zeros((d_pad, nc_pad), jnp.bfloat16)
    w_p = w_p.at[:d, :n_classes].set(w.astype(jnp.bfloat16))
    b_p = jnp.zeros((1, nc_pad), jnp.float32)
    b_p = b_p.at[0, :n_classes].set(b.astype(jnp.float32))
    y_p = jnp.zeros((b_pad, nc_pad), jnp.float32)
    y_p = y_p.at[:batch, :n_classes].set(y.astype(jnp.float32))
    m_p = jnp.zeros((b_pad, 1), jnp.float32)
    m_p = m_p.at[:batch, 0].set(mask.astype(jnp.float32))

    kernel = functools.partial(_pl_loss_kernel, th=float(threshold),
                               n_classes=n_classes)

    grid_spec = pltpu.PrefetchScalarGridSpec(
        num_scalar_prefetch=0,
        grid=(nb, nk),
        in_specs=[
            pl.BlockSpec((b_tile, tk), lambda bi, k: (bi, k)),     # x
            pl.BlockSpec((tk, nc_pad), lambda bi, k: (k, 0)),      # W
            pl.BlockSpec((1, nc_pad), lambda bi, k: (0, 0)),       # bias
            pl.BlockSpec((b_tile, nc_pad), lambda bi, k: (bi, 0)),  # y
            pl.BlockSpec((b_tile, 1), lambda bi, k: (bi, 0)),      # mask
        ],
        out_specs=pl.BlockSpec((b_tile, nc_pad), lambda bi, k: (bi, 0)),
        scratch_shapes=[pltpu.VMEM((b_tile, nc_pad), jnp.float32)],
    )

    cost = pl.CostEstimate(
        flops=2 * b_pad * d_pad * nc_pad,
        bytes_accessed=(x_p.size * 2 + w_p.size * 2
                        + (y_p.size + b_p.size + m_p.size
                           + b_pad * nc_pad) * 4),
        transcendentals=3 * b_pad * nc_pad,
    )

    out = pl.pallas_call(
        kernel,
        out_shape=jax.ShapeDtypeStruct((b_pad, nc_pad), jnp.float32),
        grid_spec=grid_spec,
        compiler_params=pltpu.CompilerParams(
            dimension_semantics=("parallel", "arbitrary"),
            vmem_limit_bytes=32 * 1024 * 1024,
        ),
        cost_estimate=cost,
    )(x_p, w_p, b_p, y_p, m_p)

    # Padded rows/lanes contribute exactly 0; divisor is the ORIGINAL batch.
    return jnp.sum(out) / float(batch)


def _reference(x, y, mask, w, b, threshold=0.95, cast_bf16=False):
    """Pure-JAX reference mirroring the PyTorch forward."""
    batch = x.shape[0]
    n_classes = y.shape[1]
    y_probs = jax.nn.softmax(y.astype(jnp.float32), axis=1)
    onehot = jax.nn.one_hot(jnp.argmax(y_probs, axis=1), n_classes,
                            dtype=jnp.float32)
    gt_mask = jnp.max((y_probs > threshold).astype(jnp.float32), axis=1)
    lt_mask = 1.0 - gt_mask
    p_target = gt_mask[:, None] * 10.0 * onehot + lt_mask[:, None] * y_probs
    xf = x.reshape(batch, -1).astype(jnp.float32)
    wf = w.astype(jnp.float32)
    if cast_bf16:
        xf = xf.astype(jnp.bfloat16).astype(jnp.float32)
        wf = wf.astype(jnp.bfloat16).astype(jnp.float32)
    logits = xf @ wf + b.astype(jnp.float32)
    log_sm = jax.nn.log_softmax(logits, axis=1)
    loss = jnp.mean(-jnp.sum(p_target * log_sm, axis=1) * mask)
    return loss


if __name__ == "__main__":
    key = jax.random.PRNGKey(0)
    k_x, k_y, k_w, k_b, k_m = jax.random.split(key, 5)

    B, C, H, W = 2, 4, 16, 16
    N_CLASSES = 10
    D = C * H * W

    x = jax.random.normal(k_x, (B, C, H, W), dtype=jnp.float32)
    y = jax.random.normal(k_y, (B, N_CLASSES), dtype=jnp.float32) * 3.0
    w = jax.random.normal(k_w, (D, N_CLASSES), dtype=jnp.float32) * 0.05
    b = jax.random.normal(k_b, (N_CLASSES,), dtype=jnp.float32) * 0.1
    mask = (jax.random.uniform(k_m, (B,)) > 0.3).astype(jnp.float32)

    loss = pl_pseudo_label_loss(x, y, mask, w, b, threshold=0.95)
    loss = jax.block_until_ready(loss)

    # Tight check vs. a bf16-consistent reference (same matmul precision).
    ref_bf16 = _reference(x, y, mask, w, b, threshold=0.95, cast_bf16=True)
    assert jnp.allclose(loss, ref_bf16, rtol=1e-2, atol=1e-2), (loss, ref_bf16)

    # Looser check vs. the full-f32 PyTorch-mirroring reference.
    ref_f32 = _reference(x, y, mask, w, b, threshold=0.95, cast_bf16=False)
    assert jnp.allclose(loss, ref_f32, rtol=5e-2, atol=5e-2), (loss, ref_f32)

    print("KERNEL_OK")
</pallas_src>

<mosaic_0001>
module attributes {stable_mosaic.version = 11 : i64} {
  func.func @_pl_loss_kernel(%arg0: i32, %arg1: i32, %arg2: memref<8x512xbf16, #tpu.memory_space<vmem>>, %arg3: memref<512x128xbf16, #tpu.memory_space<vmem>>, %arg4: memref<1x128xf32, #tpu.memory_space<vmem>>, %arg5: memref<8x128xf32, #tpu.memory_space<vmem>>, %arg6: memref<8x1xf32, #tpu.memory_space<vmem>>, %arg7: memref<8x128xf32, #tpu.memory_space<vmem>>, %arg8: memref<8x128xf32, #tpu.memory_space<vmem>>) attributes {dimension_semantics = [#tpu.dimension_semantics<parallel>, #tpu.dimension_semantics<arbitrary>], iteration_bounds = array<i64: 1, 2>, scalar_prefetch = 0 : i64, scratch_operands = 1 : i64, tpu.core_type = #tpu.core_type<tc>, window_params = [{transform_indices = @transform_0, window_bounds = array<i64: 8, 512>}, {transform_indices = @transform_1, window_bounds = array<i64: 512, 128>}, {pipeline_mode = #tpu.pipeline_mode<synchronous>, transform_indices = @transform_2, window_bounds = array<i64: 1, 128>}, {transform_indices = @transform_3, window_bounds = array<i64: 8, 128>}, {transform_indices = @transform_4, window_bounds = array<i64: 8, 1>}, {transform_indices = @transform_5, window_bounds = array<i64: 8, 128>}]} {
    %c0_i32 = arith.constant 0 : i32
    %0 = arith.cmpi eq, %arg1, %c0_i32 : i32
    %1 = arith.extui %0 : i1 to i32
    %c0_i32_0 = arith.constant 0 : i32
    %2 = arith.cmpi ne, %1, %c0_i32_0 : i32
    scf.if %2 {
      %cst_9 = arith.constant 0.000000e+00 : f32
      %12 = vector.broadcast %cst_9 : f32 to vector<8x128xf32>
      %c0_10 = arith.constant 0 : index
      %c0_11 = arith.constant 0 : index
      %13 = vector.load %arg8[%c0_10, %c0_11] : memref<8x128xf32, #tpu.memory_space<vmem>>, vector<8x128xf32>
      tpu.vector_store %arg8[%c0_10, %c0_11], %12 {strides = array<i32>} : memref<8x128xf32, #tpu.memory_space<vmem>>, vector<8x128xf32>,
    } else {
    }
    %c0 = arith.constant 0 : index
    %c0_1 = arith.constant 0 : index
    %3 = vector.load %arg8[%c0, %c0_1] : memref<8x128xf32, #tpu.memory_space<vmem>>, vector<8x128xf32>
    %c0_2 = arith.constant 0 : index
    %c0_3 = arith.constant 0 : index
    %4 = vector.load %arg2[%c0_2, %c0_3] : memref<8x512xbf16, #tpu.memory_space<vmem>>, vector<8x512xbf16>
    %c0_4 = arith.constant 0 : index
    %c0_5 = arith.constant 0 : index
    %5 = vector.load %arg3[%c0_4, %c0_5] : memref<512x128xbf16, #tpu.memory_space<vmem>>, vector<512x128xbf16>
    %cst = arith.constant dense<0.000000e+00> : vector<8x128xf32>
    %6 = tpu.matmul %4, %5, %cst {dimension_numbers = #tpu.dot_dimension_numbers<[1], [0], [0], [1], [0, 0, 1, 1], [], []>} : vector<8x512xbf16>, vector<512x128xbf16>, vector<8x128xf32> -> vector<8x128xf32>
    %7 = arith.addf %3, %6 : vector<8x128xf32>
    %c0_6 = arith.constant 0 : index
    %c0_7 = arith.constant 0 : index
    %8 = vector.load %arg8[%c0_6, %c0_7] : memref<8x128xf32, #tpu.memory_space<vmem>>, vector<8x128xf32>
    tpu.vector_store %arg8[%c0_6, %c0_7], %7 {strides = array<i32>} : memref<8x128xf32, #tpu.memory_space<vmem>>, vector<8x128xf32>,
    %c1_i32 = arith.constant 1 : i32
    %9 = arith.cmpi eq, %arg1, %c1_i32 : i32
    %10 = arith.extui %9 : i1 to i32
    %c0_i32_8 = arith.constant 0 : i32
    %11 = arith.cmpi ne, %10, %c0_i32_8 : i32
    scf.if %11 {
      %c0_9 = arith.constant 0 : index
      %c0_10 = arith.constant 0 : index
      %12 = vector.load %arg8[%c0_9, %c0_10] : memref<8x128xf32, #tpu.memory_space<vmem>>, vector<8x128xf32>
      %c0_11 = arith.constant 0 : index
      %c0_12 = arith.constant 0 : index
      %13 = vector.load %arg4[%c0_11, %c0_12] : memref<1x128xf32, #tpu.memory_space<vmem>>, vector<1x128xf32>
      %14 = vector.broadcast %13 : vector<1x128xf32> to vector<8x128xf32>
      %15 = arith.addf %12, %14 : vector<8x128xf32>
      %16 = tpu.iota {dimensions = array<i32: 1>} : vector<8x128xi32>
      %c10_i32 = arith.constant 10 : i32
      %17 = vector.broadcast %c10_i32 : i32 to vector<8x128xi32>
      %18 = arith.cmpi slt, %16, %17 : vector<8x128xi32>
      %cst_13 = arith.constant -1.000000e+30 : f32
      %19 = vector.broadcast %cst_13 : f32 to vector<8x128xf32>
      %20 = arith.select %18, %15, %19 : vector<8x128xi1>, vector<8x128xf32>
      %c0_14 = arith.constant 0 : index
      %c0_15 = arith.constant 0 : index
      %21 = vector.load %arg5[%c0_14, %c0_15] : memref<8x128xf32, #tpu.memory_space<vmem>>, vector<8x128xf32>
      %cst_16 = arith.constant -1.000000e+30 : f32
      %22 = vector.broadcast %cst_16 : f32 to vector<8x128xf32>
      %23 = arith.select %18, %21, %22 : vector<8x128xi1>, vector<8x128xf32>
      %cst_17 = arith.constant dense<0xFF800000> : vector<8xf32>
      %24 = vector.multi_reduction <maximumf>, %23, %cst_17 [1] : vector<8x128xf32> to vector<8xf32>
      %25 = vector.shape_cast %24 : vector<8xf32> to vector<8x1xf32>
      %26 = vector.broadcast %25 : vector<8x1xf32> to vector<8x128xf32>
      %27 = arith.subf %23, %26 : vector<8x128xf32>
      %28 = math.exp %27 : vector<8x128xf32>
      %cst_18 = arith.constant dense<0.000000e+00> : vector<8xf32>
      %29 = vector.multi_reduction <add>, %28, %cst_18 [1] : vector<8x128xf32> to vector<8xf32>
      %30 = vector.shape_cast %29 : vector<8xf32> to vector<8x1xf32>
      %31 = tpu.reciprocal %30 {approx = true} : vector<8x1xf32> -> vector<8x1xf32>
      %32 = vector.broadcast %31 : vector<8x1xf32> to vector<8x128xf32>
      %33 = arith.mulf %28, %32 : vector<8x128xf32>
      %cst_19 = arith.constant dense<0xFF800000> : vector<8xf32>
      %34 = vector.multi_reduction <maximumf>, %33, %cst_19 [1] : vector<8x128xf32> to vector<8xf32>
      %35 = vector.shape_cast %34 : vector<8xf32> to vector<8x1xf32>
      %36 = vector.broadcast %35 : vector<8x1xf32> to vector<8x128xf32>
      %37 = arith.cmpf oeq, %33, %36 : vector<8x128xf32>
      %c128_i32 = arith.constant 128 : i32
      %38 = vector.broadcast %c128_i32 : i32 to vector<8x128xi32>
      %39 = arith.select %37, %16, %38 : vector<8x128xi1>, vector<8x128xi32>
      %cst_20 = arith.constant dense<2147483647> : vector<8xi32>
      %40 = vector.multi_reduction <minsi>, %39, %cst_20 [1] : vector<8x128xi32> to vector<8xi32>
      %41 = vector.shape_cast %40 : vector<8xi32> to vector<8x1xi32>
      %42 = vector.broadcast %41 : vector<8x1xi32> to vector<8x128xi32>
      %43 = arith.cmpi eq, %16, %42 : vector<8x128xi32>
      %44 = arith.extui %43 : vector<8x128xi1> to vector<8x128xi32>
      %45 = arith.sitofp %44 : vector<8x128xi32> to vector<8x128xf32>
      %cst_21 = arith.constant 0.949999988 : f32
      %46 = vector.broadcast %cst_21 : f32 to vector<8x128xf32>
      %47 = arith.cmpf ogt, %33, %46 : vector<8x128xf32>
      %48 = arith.extui %47 : vector<8x128xi1> to vector<8x128xi32>
      %49 = arith.sitofp %48 : vector<8x128xi32> to vector<8x128xf32>
      %cst_22 = arith.constant dense<0xFF800000> : vector<8xf32>
      %50 = vector.multi_reduction <maximumf>, %49, %cst_22 [1] : vector<8x128xf32> to vector<8xf32>
      %51 = vector.shape_cast %50 : vector<8xf32> to vector<8x1xf32>
      %cst_23 = arith.constant 1.000000e+01 : f32
      %52 = vector.broadcast %cst_23 : f32 to vector<8x1xf32>
      %53 = arith.mulf %51, %52 : vector<8x1xf32>
      %54 = vector.broadcast %53 : vector<8x1xf32> to vector<8x128xf32>
      %55 = arith.mulf %54, %45 : vector<8x128xf32>
      %cst_24 = arith.constant 1.000000e+00 : f32
      %56 = vector.broadcast %cst_24 : f32 to vector<8x1xf32>
      %57 = arith.subf %56, %51 : vector<8x1xf32>
      %58 = vector.broadcast %57 : vector<8x1xf32> to vector<8x128xf32>
      %59 = arith.mulf %58, %33 : vector<8x128xf32>
      %60 = arith.addf %55, %59 : vector<8x128xf32>
      %cst_25 = arith.constant dense<0xFF800000> : vector<8xf32>
      %61 = vector.multi_reduction <maximumf>, %20, %cst_25 [1] : vector<8x128xf32> to vector<8xf32>
      %62 = vector.shape_cast %61 : vector<8xf32> to vector<8x1xf32>
      %63 = vector.broadcast %62 : vector<8x1xf32> to vector<8x128xf32>
      %64 = arith.subf %20, %63 : vector<8x128xf32>
      %65 = math.exp %64 : vector<8x128xf32>
      %cst_26 = arith.constant dense<0.000000e+00> : vector<8xf32>
      %66 = vector.multi_reduction <add>, %65, %cst_26 [1] : vector<8x128xf32> to vector<8xf32>
      %67 = vector.shape_cast %66 : vector<8xf32> to vector<8x1xf32>
      %68 = math.log %67 : vector<8x1xf32>
      %69 = vector.broadcast %68 : vector<8x1xf32> to vector<8x128xf32>
      %70 = arith.subf %64, %69 : vector<8x128xf32>
      %71 = arith.mulf %60, %70 : vector<8x128xf32>
      %cst_27 = arith.constant 0.000000e+00 : f32
      %72 = vector.broadcast %cst_27 : f32 to vector<8x128xf32>
      %73 = arith.select %18, %71, %72 : vector<8x128xi1>, vector<8x128xf32>
      %c0_28 = arith.constant 0 : index
      %c0_29 = arith.constant 0 : index
      %74 = vector.load %arg6[%c0_28, %c0_29] : memref<8x1xf32, #tpu.memory_space<vmem>>, vector<8x1xf32>
      %75 = vector.broadcast %74 : vector<8x1xf32> to vector<8x128xf32>
      %76 = arith.mulf %73, %75 : vector<8x128xf32>
      %cst_30 = arith.constant 0.000000e+00 : f32
      %77 = vector.broadcast %cst_30 : f32 to vector<8x128xf32>
      %78 = arith.subf %77, %76 : vector<8x128xf32>
      %c0_31 = arith.constant 0 : index
      %c0_32 = arith.constant 0 : index
      %79 = vector.load %arg7[%c0_31, %c0_32] : memref<8x128xf32, #tpu.memory_space<vmem>>, vector<8x128xf32>
      tpu.vector_store %arg7[%c0_31, %c0_32], %78 {strides = array<i32>} : memref<8x128xf32, #tpu.memory_space<vmem>>, vector<8x128xf32>,
    } else {
    }
    return
  }
  func.func @transform_0(%arg0: i32, %arg1: i32) -> (i32, i32) {
    %c0_i32 = arith.constant 0 : i32
    return %arg0, %arg1 : i32, i32
  }
  func.func @transform_1(%arg0: i32, %arg1: i32) -> (i32, i32) {
    %c0_i32 = arith.constant 0 : i32
    %c0_i32_0 = arith.constant 0 : i32
    return %arg1, %c0_i32 : i32, i32
  }
  func.func @transform_2(%arg0: i32, %arg1: i32) -> (i32, i32) {
    %c0_i32 = arith.constant 0 : i32
    %c0_i32_0 = arith.constant 0 : i32
    %c0_i32_1 = arith.constant 0 : i32
    return %c0_i32, %c0_i32_0 : i32, i32
  }
  func.func @transform_3(%arg0: i32, %arg1: i32) -> (i32, i32) {
    %c0_i32 = arith.constant 0 : i32
    %c0_i32_0 = arith.constant 0 : i32
    return %arg0, %c0_i32 : i32, i32
  }
  func.func @transform_4(%arg0: i32, %arg1: i32) -> (i32, i32) {
    %c0_i32 = arith.constant 0 : i32
    %c0_i32_0 = arith.constant 0 : i32
    return %arg0, %c0_i32 : i32, i32
  }
  func.func @transform_5(%arg0: i32, %arg1: i32) -> (i32, i32) {
    %c0_i32 = arith.constant 0 : i32
    %c0_i32_0 = arith.constant 0 : i32
    return %arg0, %c0_i32 : i32, i32
  }
}

</mosaic_0001>

<bundles_post_ra>
// kernel: tpu_custom_call.1
= control target key start
LH: loop header
LB: loop body
LE: loop exit
PB: predicated region body
PF: predicated region fallthrough
CT: control target
= control target key end

     0   :  { %10 = vsyncpa [#allocation4], 0  ;;  %s1490_s0 = inlined_call_operand.hbm [shape: bf16[8,1024], index: 0, kind: input, shape index: {}]   ;;  %s1491_s1 = inlined_call_operand.hbm [shape: bf16[1024,128], index: 1, kind: input, shape index: {}]   ;;  %s1492_s2 = inlined_call_operand.vmem [shape: f32[1,128], index: 2, kind: input, shape index: {}]   ;;  %s1493_s3 = inlined_call_operand.vmem [shape: f32[8,128], index: 3, kind: input, shape index: {}]   ;;  %s1494_s4 = inlined_call_operand.vmem [shape: f32[8,1], index: 4, kind: input, shape index: {}]   ;;  %s1495_s5 = inlined_call_operand.hbm [shape: f32[8,128], index: 5, kind: output, shape index: {}]  }
   0x1   :  { %12 = vsyncpa [#allocation4 + $0x1], 0 }
   0x2   :  { %13 = vsyncpa [#allocation7], 0 }
   0x3   :  { %15 = vsyncpa [#allocation7 + $0x1], 0 }
   0x4   :  { %16 = vsyncpa [#allocation5], 0  ;;  %s1318_s18 = smov 0   ;;  %s1320_s19 = smov 0  }
   0x5   :  { %s1322_s20 = smov 0   ;;  %s1324_s21 = smov 0  }
   0x6   :  { %s1326_s22 = smov 0   ;;  %s1328_s23 = smov 0  }
   0x7 LB: > { %s867_s24 = sadd.s32 4294967295, %s1280_s23   ;;  %s31_s25 = sadd.s32 1, %s1276_s22  ;;  %s1280_s23 = sphi %s1328_s23, %s22_s23   ;;  %s1276_s22 = sphi %s1326_s22, %s1503_s22   ;;  %s1272_s21 = sphi %s1324_s21, %s1502_s21   ;;  %s1268_s20 = sphi %s1322_s20, %s1501_s20   ;;  %s1264_s19 = sphi %s1320_s19, %s1500_s19   ;;  %s1260_s18 = sphi %s1318_s18, %s1499_s18  }
   0x8   : > { %p32_p0 = scmp.ge.s32.totalorder %s31_s25, 2  ;;  %s43_s26 = sadd.s32 1, %s1268_s20 }
   0x9   : > { %p50_p1 = scmp.ne.s32.totalorder %s1268_s20, %s1264_s19  ;;  %p51_p2 = scmp.eq.s32.totalorder %s1280_s23, 0 }
   0xa   : > { %s1505_s25 = smov (%p32_p0, %s31_s25), 0  ;;  %p56_p4 = scmp.ne.s32.totalorder %s1264_s19, %s1260_s18 }
   0xb   : > { %p1354_p3 = por %p51_p2, %p50_p1  ;;  %s39_s28 = ssub.s32 %s1276_s22, %s1505_s25 }
   0xc   : > { %p57_p5 = scmp.eq.s32.totalorder %s867_s24, 0  ;;  %p41_p6 = scmp.eq.s32.totalorder %s39_s28, 0 }
   0xd   : > { %p1066_p8 = scmp.lt.s32.totalorder %s1280_s23, 2  ;;  %s1372_s6 = sand.u32 1, %s1268_s20  }
   0xe   : > { %p1363_p7 = por %p57_p5, %p56_p4  ;;  %s1017_s7 = sshll.u32 %s1276_s22, 4 }
   0xf   : > { %s1369_s30 = scalar_select %p41_p6, %s1268_s20, %s43_s26  }
  0x10   : > { %s872_s8 = sshll.u32 %s1372_s6, 4  ;;  %s233_s11 = scalar_lea.hbm %s1490_s0, %s1017_s7 }
  0x11   : > { %s235_s12 = sshll.u32 %s233_s11, 4  ;;  %s226_s13 = scalar_lea.vmem [#allocation3], %s872_s8  ;;  %s236_s12 = int_to_ptr.hbm [resolvable:$true] %s235_s12 }
  0x12   : > { %s237_s14 = sshll.u32 %s226_s13, 4  ;;  %p1381_p9 = pnand %p1066_p8, %p1354_p3  ;;  %s238_s14 = int_to_ptr.vmem [resolvable:$true] %s237_s14 }
  0x13   : > { %p878_p10 = scmp.ge.s32.totalorder %s1280_s23, 1  ;;  %p264_p11 = scmp.lt.s32.totalorder %s1280_s23, 3 }
  0x14   : > { %s875_s16 = sshll.u32 %s1372_s6, 8  ;;  %s223_s17 = scalar_lea.sflag [#allocation4], %s1372_s6 }
  0x15   : > { %1062 = dma.hbm_to_vmem [thread:$0]  (!%p1381_p9), %s236_s12, 256, %s238_s14, %s223_s17  }
  0x16   : > { %p265_p12 = pnand %p878_p10, %p264_p11  ;;  %s1018_s18 = sshll.u32 %s1276_s22, 8 }
  0x17   : > { %s248_s26 = scalar_lea.vmem [#allocation6], %s875_s16  ;;  %s253_s27 = scalar_lea.hbm %s1491_s1, %s1018_s18 }
  0x18   : > { %s256_s28 = sshll.u32 %s248_s26, 4  ;;  %s254_s9 = sshll.u32 %s253_s27, 4  ;;  %s257_s28 = int_to_ptr.vmem [resolvable:$true] %s256_s28  ;;  %s255_s9 = int_to_ptr.hbm [resolvable:$true] %s254_s9 }
  0x19   : > { %s245_s10 = scalar_lea.sflag [#allocation7], %s1372_s6  ;;  %s1282_s11 = smov 64  }
  0x1a   : > { %s1283_s13 = smov 4   ;;  %268 = sbr.rel (%p265_p12) target bundleno = 857 (0x359), region = 40 }
  0x1b   : > { %1065 = dma.hbm_to_vmem [thread:$0]  (!%p1381_p9), %s255_s9, 4096, %s257_s28, %s245_s10, %s1282_s11, %s1282_s11, %s1283_s13  }
  0x1c   : > { %s270_s12 = sand.u32 (!%p265_p12), 1, %s1264_s19  }
  0x1d   : > { %s879_s14 = sshll.u32 (!%p265_p12), %s270_s12, 4  ;;  %s271_s17 = scalar_lea.sflag (!%p265_p12), [#allocation4], %s270_s12 }
  0x1e   : > { %s1399_s16 = scalar_lea.vmem (!%p265_p12), [#allocation3], %s879_s14 }
  0x1f   : > { %1247 = dma.done.wait (%p1363_p7), %s271_s17, 256  }
  0x20   : > { %1249 = vsyncadd (%p1363_p7), %s271_s17, 4294967040  ;;  %s880_s18 = sshll.u32 %s270_s12, 8  ;;  %s281_s6 = scalar_lea.sflag [#allocation7], %s270_s12 }
  0x21   : > { %s1405_s26 = scalar_lea.vmem [#allocation6], %s880_s18 }
  0x22   : > { %1251 = dma.done.wait (%p1363_p7), %s281_s6, 4096  }
  0x23   : > { %1253 = vsyncadd (%p1363_p7), %s281_s6, 4294963200  ;;  %p881_p13 = scmp.ne.s32.totalorder %s1272_s21, 0 }
  0x25   : > { %333 = sbr.rel (%p881_p13) target bundleno = 44 (0x2c), region = 52 }
  0x2a   : > { %v1284_v0 = vmov 0.0  }
  0x2b   : > { %334 = vst [vmem:[#allocation2] sm:$0xff] %v1284_v0 }
  0x2c PF: > { %v1026_v1 = vld [vmem:[%s1405_s26 + $0x38] sm:$0xff]  ;;  %v1025_v5 = vld [vmem:[%s1405_s26 + $0x30] sm:$0xff]  ;;  %v1024_v9 = vld [vmem:[%s1405_s26 + $0x28] sm:$0xff]  ;;  %p1010_p0 = scmp.ne.s32.totalorder %s1272_s21, 1 }
  0x2d   : > { %v1034_v2 = vld [vmem:[%s1405_s26 + $0x78] sm:$0xff]  ;;  %608 = vmatpush.bf16.msra.mxu0 %v1026_v1  ;;  %v1033_v6 = vld [vmem:[%s1405_s26 + $0x70] sm:$0xff]  ;;  %v1032_v10 = vld [vmem:[%s1405_s26 + $0x68] sm:$0xff] }
  0x2e   : > { %v1042_v3 = vld [vmem:[%s1405_s26 + $0xb8] sm:$0xff]  ;;  %621 = vmatpush.bf16.msra.mxu1 %v1034_v2  ;;  %v1041_v7 = vld [vmem:[%s1405_s26 + $0xb0] sm:$0xff]  ;;  %v1040_v11 = vld [vmem:[%s1405_s26 + $0xa8] sm:$0xff] }
  0x2f   : > { %v1050_v4 = vld [vmem:[%s1405_s26 + $0xf8] sm:$0xff]  ;;  %634 = vmatpush.bf16.msra.mxu2 %v1042_v3  ;;  %v1049_v8 = vld [vmem:[%s1405_s26 + $0xf0] sm:$0xff]  ;;  %v1048_v12 = vld [vmem:[%s1405_s26 + $0xe8] sm:$0xff] }
  0x30   : > { %647 = vmatpush.bf16.msra.mxu3 %v1050_v4  ;;  %v1023_v13 = vld [vmem:[%s1405_s26 + $0x20] sm:$0xff]  ;;  %v1022_v17 = vld [vmem:[%s1405_s26 + $0x18] sm:$0xff]  ;;  %v1021_v21 = vld [vmem:[%s1405_s26 + $0x10] sm:$0xff] }
  0x31   : > { %609 = vmatpush.bf16.msra.mxu0 %v1025_v5  ;;  %v1031_v14 = vld [vmem:[%s1405_s26 + $0x60] sm:$0xff]  ;;  %v1030_v18 = vld [vmem:[%s1405_s26 + $0x58] sm:$0xff]  ;;  %v1029_v22 = vld [vmem:[%s1405_s26 + $0x50] sm:$0xff] }
  0x32   : > { %622 = vmatpush.bf16.msra.mxu1 %v1033_v6  ;;  %v1039_v15 = vld [vmem:[%s1405_s26 + $0xa0] sm:$0xff]  ;;  %v1038_v19 = vld [vmem:[%s1405_s26 + $0x98] sm:$0xff]  ;;  %v1037_v23 = vld [vmem:[%s1405_s26 + $0x90] sm:$0xff] }
  0x33   : > { %635 = vmatpush.bf16.msra.mxu2 %v1041_v7  ;;  %v1047_v16 = vld [vmem:[%s1405_s26 + $0xe0] sm:$0xff]  ;;  %v1046_v20 = vld [vmem:[%s1405_s26 + $0xd8] sm:$0xff]  ;;  %v1045_v24 = vld [vmem:[%s1405_s26 + $0xd0] sm:$0xff] }
  0x34   : > { %648 = vmatpush.bf16.msra.mxu3 %v1049_v8  ;;  %v1020_v25 = vld [vmem:[%s1405_s26 + $0x8] sm:$0xff]  ;;  %v336_v27 = vld [vmem:[%s1399_s16] sm:$0xff]  ;;  %v335_v51 = vld [vmem:[#allocation2] sm:$0xff] }
  0x35   : > { %610 = vmatpush.bf16.msra.mxu0 %v1024_v9  ;;  %v1028_v26 = vld [vmem:[%s1405_s26 + $0x48] sm:$0xff]  ;;  %v404_v31 = vunpack.c.l.b16 %v336_v27  ;;  %v405_v32 = vunpack.c.h.b16 %v336_v27  ;;  %v1019_v33 = vld [vmem:[%s1405_s26] sm:$0xff] }
  0x36   : > { %623 = vmatpush.bf16.msra.mxu1 %v1032_v10  ;;  %v1036_v28 = vld [vmem:[%s1405_s26 + $0x88] sm:$0xff]  ;;  %v1027_v34 = vld [vmem:[%s1405_s26 + $0x40] sm:$0xff] }
  0x37   : > { %636 = vmatpush.bf16.msra.mxu2 %v1040_v11  ;;  %v1044_v29 = vld [vmem:[%s1405_s26 + $0xc8] sm:$0xff]  ;;  %v1035_v37 = vld [vmem:[%s1405_s26 + $0x80] sm:$0xff]  ;;  %v408_v39 = vpack.c.b16 %v404_v31, %v404_v31  ;;  %v409_v40 = vpack.c.b16 %v405_v32, %v405_v32 }
  0x38   : > { %649 = vmatpush.bf16.msra.mxu3 %v1048_v12  ;;  %v337_v30 = vld [vmem:[%s1399_s16 + $0x8] sm:$0xff]  ;;  %v1043_v38 = vld [vmem:[%s1405_s26 + $0xc0] sm:$0xff] }
  0x39   : > { %611 = vmatpush.bf16.msra.mxu0 %v1023_v13  ;;  %v406_v35 = vunpack.c.l.b16 %v337_v30  ;;  %v407_v36 = vunpack.c.h.b16 %v337_v30 }
  0x3a   : > { %624 = vmatpush.bf16.msra.mxu1 %v1031_v14 }
  0x3b   : > { %637 = vmatpush.bf16.msra.mxu2 %v1039_v15  ;;  %v410_v41 = vpack.c.b16 %v406_v35, %v406_v35  ;;  %v411_v42 = vpack.c.b16 %v407_v36, %v407_v36 }
  0x3c   : > { %650 = vmatpush.bf16.msra.mxu3 %v1047_v16 }
  0x3d   : > { %612 = vmatpush.bf16.msra.mxu0 %v1022_v17 }
  0x3e   : > { %625 = vmatpush.bf16.msra.mxu1 %v1030_v18 }
  0x3f   : > { %638 = vmatpush.bf16.msra.mxu2 %v1038_v19 }
  0x40   : > { %651 = vmatpush.bf16.msra.mxu3 %v1046_v20 }
  0x41   : > { %613 = vmatpush.bf16.msra.mxu0 %v1021_v21 }
  0x42   : > { %626 = vmatpush.bf16.msra.mxu1 %v1029_v22 }
  0x43   : > { %639 = vmatpush.bf16.msra.mxu2 %v1037_v23 }
  0x44   : > { %652 = vmatpush.bf16.msra.mxu3 %v1045_v24 }
  0x45   : > { %614 = vmatpush.bf16.msra.mxu0 %v1020_v25 }
  0x46   : > { %627 = vmatpush.bf16.msra.mxu1 %v1028_v26 }
  0x47   : > { %640 = vmatpush.bf16.msra.mxu2 %v1036_v28 }
  0x48   : > { %653 = vmatpush.bf16.msra.mxu3 %v1044_v29 }
  0x49   : > { %615 = vmatpush.bf16.msra.mxu0 %v1019_v33 }
  0x4a   : > { %628 = vmatpush.bf16.msra.mxu1 %v1027_v34 }
  0x4b   : > { %641 = vmatpush.bf16.msra.mxu2 %v1035_v37 }
  0x4c   : > { %654 = vmatpush.bf16.msra.mxu3 %v1043_v38  ;;  %616 = vmatmul.bf16.vlgmr.msra.gmra.mxu0 %v408_v39 }
  0x4d   : > { %629 = vmatmul.bf16.vlgmr.msra.gmra.mxu1 %v409_v40 }
  0x4e   : > { %642 = vmatmul.bf16.vlgmr.msra.gmra.mxu2 %v410_v41 }
  0x4f   : > { %655 = vmatmul.bf16.vlgmr.msra.gmra.mxu3 %v411_v42 }
  0xc9   : > { %v617_v43 = vpop.f32.mrf.mxu0 }
  0xca   : > { %v630_v44 = vpop.f32.mrf.mxu1 }
  0xcb   : > { %v631_v45 = vadd.f32 %v630_v44, %v617_v43 }
  0xd1   : > { %v643_v46 = vpop.f32.mrf.mxu2  ;;  %v619_v49 = vpop.f32.mrf.mxu0 }
  0xd2   : > { %v656_v47 = vpop.f32.mrf.mxu3  ;;  %v644_v48 = vadd.f32 %v643_v46, %v631_v45  ;;  %v632_v50 = vpop.f32.mrf.mxu1 }
  0xd4   : > { %v657_v52 = vadd.f32 %v656_v47, %v644_v48 }
  0xd6   : > { %v660_v53 = vadd.f32 %v657_v52, %v335_v51  ;;  %665 = sbr.rel (%p1010_p0) target bundleno = 851 (0x353), region = 56 }
  0xd8   : > { %661 = vst [vmem:[#allocation2] sm:$0xff] %v660_v53 }
  0xd9   : > { %v645_v54 = vpop.f32.mrf.mxu2 }
  0xda   : > { %v658_v55 = vpop.f32.mrf.mxu3 }
  0xdb   : > { %v672_v56 = vlaneseq  ;;  %v676_v58 = vld [vmem:[%s1493_s3] sm:$0xff]  ;;  %v1285_v7 = vmov 0.0   ;;  %v1286_v18 = vmov 0  }
  0xdc   : > { %v1125_v2 = vld [vmem:[%s1492_s2] ss:$0 sm:$0xff]  ;;  %1123 = vset.pattern.permute.xlu2 %v1286_v18  ;;  %1124 = vset.pattern.permute.xlu0 %v1286_v18 }
  0xdd   : > { %v1447_v57 = vand.u32 127, %v672_v56  ;;  %v730_v17 = vld [vmem:[%s1494_s4] sm:$0xff] }
  0xdf   : > { %vm674_vm0 = vcmp.lt.s32.totalorder %v1447_v57, 10  ;;  %v666_v4 = vld [vmem:[#allocation2] sm:$0xff] }
  0xe0   : > { %v677_v59 = vsel %vm674_vm0, %v676_v58, -1e+30  ;;  %v671_v5 = vadd.f32 %v1125_v2, %v666_v4 }
  0xe1   : > { %678 = vmax.xlane.f32.xlu0 %v677_v59 }
  0xe2   : > { %v675_v6 = vsel %vm674_vm0, %v671_v5, -1e+30 }
 0x154   : > { %v679_v60 = vpop.xlane.xlu0 %678 }
 0x155   : > { %v680_v61 = vsub.f32 %v677_v59, %v679_v60 }
 0x157   : > { %v681_v62 = vmul.f32 1.442695, %v680_v61 }
 0x159   : > { %1126 = vpow2.f32 %v681_v62 }
 0x15f   : > { %v1127_v63 = vpop.eup %1126 }
 0x160   : > { %683 = vadd.xlane.f32.xlu0 %v1127_v63 }
 0x1d3   : > { %v684_v0 = vpop.xlane.xlu0 %683 }
 0x1d4   : > { %1128 = vrcp.f32 %v684_v0 }
 0x1da   : > { %v1129_v1 = vpop.eup %1128 }
 0x1db   : > { %v686_v3 = vmul.f32 %v1129_v1, %v1127_v63 }
 0x1dd   : > { %687 = vmax.xlane.f32.xlu1 %v686_v3  ;;  %vm708_vm1 = vcmp.gt.f32.partialorder %v686_v3, 0.95 }
 0x1de   : > { %v1012_v8 = vsel %vm708_vm1, 1.0, %v1285_v7 }
 0x1e5   : > { %718 = vmax.xlane.f32.xlu1 %v675_v6 }
 0x1ed   : > { %711 = vmax.xlane.f32.xlu1 %v1012_v8 }
 0x250   : > { %v688_v9 = vpop.xlane.xlu1 %687 }
 0x251   : > { %vm689_vm2 = vcmp.eq.f32.partialorder %v686_v3, %v688_v9 }
 0x252   : > { %v690_v10 = vsel %vm689_vm2, %v1447_v57, 128 }
 0x253   : > { %v692_v11 = vshra.s32 %v690_v10, 16  ;;  %v691_v19 = vand.u32 65535, %v690_v10 }
 0x255   : > { %v694_v12 = vcvt.s32.f32 %v692_v11  ;;  %v693_v21 = vcvt.s32.f32 %v691_v19 }
 0x257   : > { %695 = vmin.xlane.f32.xlu2 %v694_v12 }
 0x258   : > { %v719_v13 = vpop.xlane.xlu1 %718 }
 0x259   : > { %v720_v14 = vsub.f32 %v675_v6, %v719_v13 }
 0x25b   : > { %v721_v15 = vmul.f32 1.442695, %v720_v14 }
 0x25d   : > { %1130 = vpow2.f32 %v721_v15 }
 0x260   : > { %v712_v25 = vpop.xlane.xlu1 %711 }
 0x261   : > { %v715_v30 = vsub.f32 1.0, %v712_v25  ;;  %v713_v32 = vmul.f32 10.0, %v712_v25 }
 0x263   : > { %v1131_v16 = vpop.eup %1130  ;;  %v716_v35 = vmul.f32 %v715_v30, %v686_v3 }
 0x264   : > { %723 = vadd.xlane.f32.xlu2 %v1131_v16 }
 0x27c   : > { %733 = vperm.xlu2 %1123, %v730_v17  }
 0x2ca   : > { %v696_v20 = vpop.xlane.xlu2 %695 }
 0x2cb   : > { %vm697_vm3 = vcmp.eq.f32.partialorder %v694_v12, %v696_v20  ;;  %v702_v24 = vcvt.f32.s32 %v696_v20 }
 0x2cc   : > { %v698_v22 = vsel %vm697_vm3, %v693_v21, inf }
 0x2cd   : > { %699 = vmin.xlane.f32.xlu0 %v698_v22  ;;  %v703_v27 = vshll.u32 %v702_v24, 16 }
 0x2d7   : > { %v724_v23 = vpop.xlane.xlu2 %723 }
 0x2d8   : > { %1132 = vlog2.f32 %v724_v23 }
 0x2de   : > { %v1133_v29 = vpop.eup %1132 }
 0x2df   : > { %v726_v33 = vmul.f32 0.6931472, %v1133_v29  ;;  %v734_v39 = vpop.permute.xlu2 %733 }
 0x2e1   : > { %v727_v37 = vsub.f32 %v720_v14, %v726_v33 }
 0x340   : > { %v700_v26 = vpop.xlane.xlu0 %699 }
 0x341   : > { %v701_v28 = vcvt.f32.s32 %v700_v26 }
 0x343   : > { %v704_v31 = vadd.s32 %v703_v27, %v701_v28 }
 0x345   : > { %vm705_vm4 = vcmp.eq.s32.totalorder %v1447_v57, %v704_v31 }
 0x346   : > { %v1011_v34 = vsel %vm705_vm4, 1.0, %v1285_v7 }
 0x347   : > { %v714_v36 = vmul.f32 %v1011_v34, %v713_v32 }
 0x349   : > { %v717_v38 = vadd.f32 %v716_v35, %v714_v36 }
 0x34b   : > { %v728_v40 = vmul.f32 %v727_v37, %v717_v38 }
 0x34d   : > { %v729_v41 = vsel %vm674_vm0, %v728_v40, 0.0 }
 0x34e   : > { %v736_v42 = vmul.f32 %v734_v39, %v729_v41 }
 0x350   : > { %v737_v43 = vsub.f32 0.0, %v736_v42 }
 0x352   : > { %738 = vst [vmem:[#allocation8] sm:$0xff] %v737_v43 }
 0x353 PF: > { %p1067_p1 = scmp.eq.s32.totalorder %s867_s24, 1  ;;  %s749_s10 = sshll.u32 %s1495_s5, 4  ;;  %s750_s10 = int_to_ptr.hbm [resolvable:$true] %s749_s10 }
 0x354   : > { %s1287_s11 = smov [#allocation8]  }
 0x355   : > { %s747_s13 = sshll.u32 %s1287_s11, 4  ;;  %s748_s13 = int_to_ptr.vmem [resolvable:$true] %s747_s13 }
 0x356   : > { %1056 = dma.vmem_to_hbm [thread:$0]  (%p1067_p1), %s748_s13, 128, %s750_s10, [#allocation5]  }
 0x357   : > { %1255 = dma.done.wait (%p1067_p1), [#allocation5], 128  }
 0x358   : > { %1257 = vsyncadd (%p1067_p1), [#allocation5], 4294967168 }
 0x359 PF: > { %s22_s23 = sadd.s32 1, %s1280_s23   ;;  %s1499_s18 = smov %s1264_s19 }
 0x35a   : > { %p19_p2 = scmp.ge.s32.totalorder %s22_s23, 4   ;;  %s1500_s19 = smov %s1268_s20 }
 0x35b   : > { %s1501_s20 = smov %s1369_s30  ;;  %s1502_s21 = smov %s1276_s22 }
 0x35c   : > { %s1503_s22 = smov %s1505_s25  ;;  %21 = sbr.rel (!%p19_p2) target bundleno = 7 (0x7), region = 105 }
 0x361   :  { %763 = vsyncpa [#allocation4], 1 }
 0x362   :  { %765 = vsyncpa [#allocation4 + $0x1], 1 }
 0x363   :  { %766 = vsyncpa [#allocation7], 1 }
 0x364   :  { %768 = vsyncpa [#allocation7 + $0x1], 1 }
 0x365   :  { %769 = vsyncpa [#allocation5], 1 }
 0x366   :  { %771 = vsyncpa [#allocation5 + $0x1], 1 }

</bundles_post_ra>
